<compile_context>
chip_gen: v5e
topology: v5e:2x2
jax: 0.10.0
libtpu: 0.0.40
codegen_flags: <defaults>
</compile_context>

<pallas_src>
import functools

import jax
import jax.numpy as jnp
from jax.experimental import pallas as pl
from jax.experimental.pallas import tpu as pltpu


def _round_up(n: int, m: int) -> int:
    return ((n + m - 1) // m) * m


# ----------------------------- kernels --------------------------------------


def _mlp_g_kernel(x_ref, w1_ref, b1_ref, w2_ref, b2_ref, wg_ref, bg_ref, o_ref):
    cdt = w1_ref.dtype
    # linear1 + relu (MXU matmul, f32 accumulate; bias/ReLU in f32).
    # x arrives in its native dtype and is cast to the compute dtype here.
    h = jnp.dot(x_ref[...].astype(cdt), w1_ref[...],
                preferred_element_type=jnp.float32)
    h = jnp.maximum(h + b1_ref[...], 0.0)
    # linear2 + relu
    h = jnp.dot(h.astype(cdt), w2_ref[...], preferred_element_type=jnp.float32)
    h = jnp.maximum(h + b2_ref[...], 0.0)
    # linear_g + relu
    h = jnp.dot(h.astype(cdt), wg_ref[...], preferred_element_type=jnp.float32)
    h = jnp.maximum(h + bg_ref[...], 0.0)
    o_ref[...] = h.astype(o_ref.dtype)


def _mlp_ref_kernel(x_ref, w1_ref, b1_ref, w2_ref, b2_ref, o_ref):
    cdt = w1_ref.dtype
    h = jnp.dot(x_ref[...].astype(cdt), w1_ref[...],
                preferred_element_type=jnp.float32)
    h = jnp.maximum(h + b1_ref[...], 0.0)
    h = jnp.dot(h.astype(cdt), w2_ref[...], preferred_element_type=jnp.float32)
    h = jnp.maximum(h + b2_ref[...], 0.0)
    o_ref[...] = h.astype(o_ref.dtype)


# -------------------------- parameter preparation ---------------------------


def prepare_params(params, *, use_bf16=True, lane_multiple=128):
    """One-time setup: pad feature dims to lane multiples and cast weights.

    Zero-padding is exact through Linear (+0 weight rows/cols, +0 bias) + ReLU.
    Returns (padded_arrays_dict, static_metadata_dict).
    """
    w1, b1 = params["w1"], params["b1"]
    w2, b2 = params["w2"], params["b2"]
    wg, bg = params["wg"], params["bg"]
    in_dim, hid_dim = w1.shape
    out_dim = w2.shape[1]
    g_dim = wg.shape[1]

    in_p = _round_up(in_dim, lane_multiple)
    hid_p = _round_up(hid_dim, lane_multiple)
    out_p = _round_up(out_dim, lane_multiple)
    g_p = _round_up(g_dim, lane_multiple)

    cdt = jnp.bfloat16 if use_bf16 else jnp.float32

    def pad_w(w, rows, cols):
        return jnp.pad(w, ((0, rows - w.shape[0]),
                           (0, cols - w.shape[1]))).astype(cdt)

    def pad_b(b, cols):  # bias kept in f32 as a (1, F) row for broadcast
        return jnp.pad(b, (0, cols - b.shape[0])).reshape(1, -1).astype(jnp.float32)

    arrays = {
        "w1": pad_w(w1, in_p, hid_p), "b1": pad_b(b1, hid_p),
        "w2": pad_w(w2, hid_p, out_p), "b2": pad_b(b2, out_p),
        "wg": pad_w(wg, out_p, g_p), "bg": pad_b(bg, g_p),
    }
    meta = {"in_dim": in_dim, "hid_dim": hid_dim, "out_dim": out_dim,
            "g_dim": g_dim, "in_p": in_p, "hid_p": hid_p,
            "out_p": out_p, "g_p": g_p}
    return arrays, meta


# ------------------------------- forward ------------------------------------


@functools.partial(jax.jit, static_argnames=("ref", "block_b", "out_dim", "g_dim"))
def _forward(x, w1, b1, w2, b2, wg, bg, *, ref, block_b, out_dim, g_dim):
    B = x.shape[0]
    in_p = w1.shape[0]
    hid_p = w1.shape[1]
    out_p = w2.shape[1]
    g_p = wg.shape[1]

    # Pad x's feature dim only when needed (no dtype cast here; cast in-kernel).
    if x.shape[1] != in_p:
        x = jnp.pad(x, ((0, 0), (0, in_p - x.shape[1])))

    # Batch tile: large MXU-friendly tiles; no forced multi-step split
    # (single-TC v5e/v6e pay pure overhead for it).  Round to 16 rows
    # (bf16 sublane packing) when the batch allows, else to 8.
    bb = min(_round_up(block_b, 8), _round_up(B, 8))
    if bb % 16 != 0 and _round_up(bb, 16) <= _round_up(B, 8):
        bb = _round_up(bb, 16)
    grid = (pl.cdiv(B, bb),)

    # Weights/biases: whole array resident in VMEM, single-buffered,
    # fetched once for the entire grid.
    w_spec = pl.BlockSpec(memory_space=pltpu.MemorySpace.VMEM)
    x_spec = pl.BlockSpec((bb, in_p), lambda i: (i, 0))
    last_p = out_p if ref else g_p
    out_spec = pl.BlockSpec((bb, last_p), lambda i: (i, 0))

    # Explicit VMEM budget: resident weights (single buffered) + double-buffered
    # x / out tiles + f32 intermediates, with 2x margin and a 32 MiB floor.
    def nbytes(a):
        return a.size * a.dtype.itemsize

    weight_bytes = nbytes(w1) + nbytes(b1) + nbytes(w2) + nbytes(b2)
    if not ref:
        weight_bytes += nbytes(wg) + nbytes(bg)
    stream_bytes = 2 * bb * in_p * x.dtype.itemsize + 2 * bb * last_p * x.dtype.itemsize
    interm_bytes = bb * (in_p + hid_p + out_p + g_p) * 4
    vmem_limit = max(2 * (weight_bytes + stream_bytes + interm_bytes), 32 << 20)
    vmem_limit = int(min(vmem_limit, 100 << 20))

    cparams = pltpu.CompilerParams(
        dimension_semantics=("parallel",),   # lets v7x shard the batch grid
        vmem_limit_bytes=vmem_limit)

    if ref:
        out_padded = pl.pallas_call(
            _mlp_ref_kernel,
            out_shape=jax.ShapeDtypeStruct((B, out_p), x.dtype),
            grid_spec=pltpu.PrefetchScalarGridSpec(
                num_scalar_prefetch=0,
                grid=grid,
                in_specs=[x_spec, w_spec, w_spec, w_spec, w_spec],
                out_specs=out_spec,
            ),
            compiler_params=cparams,
        )(x, w1, b1, w2, b2)
        return out_padded if out_dim == out_p else out_padded[:, :out_dim]

    out_padded = pl.pallas_call(
        _mlp_g_kernel,
        out_shape=jax.ShapeDtypeStruct((B, g_p), x.dtype),
        grid_spec=pltpu.PrefetchScalarGridSpec(
            num_scalar_prefetch=0,
            grid=grid,
            in_specs=[x_spec, w_spec, w_spec, w_spec, w_spec, w_spec, w_spec],
            out_specs=out_spec,
        ),
        compiler_params=cparams,
    )(x, w1, b1, w2, b2, wg, bg)
    return out_padded if g_dim == g_p else out_padded[:, :g_dim]


def linear_probe_glayer(x, prepared, *, ref=False, block_b=256):
    """Forward pass of LinearProbe_Glayer.

    x: [B, input_size]
    prepared: output of prepare_params(params) (padded + pre-cast weights).
    """
    arrays, meta = prepared
    assert x.ndim == 2 and x.shape[1] == meta["in_dim"], x.shape
    return _forward(x, arrays["w1"], arrays["b1"], arrays["w2"], arrays["b2"],
                    arrays["wg"], arrays["bg"],
                    ref=ref, block_b=block_b,
                    out_dim=meta["out_dim"], g_dim=meta["g_dim"])


# ------------------------------ test harness --------------------------------


def init_params(key, input_size, hidden_size, output_size, g_size):
    """PyTorch-style uniform init. Weights stored TRANSPOSED: shape [in, out]."""
    ks = jax.random.split(key, 6)

    def lin(kw, kb, fan_in, fan_out):
        bound = 1.0 / jnp.sqrt(fan_in)
        w = jax.random.uniform(kw, (fan_in, fan_out), jnp.float32, -bound, bound)
        b = jax.random.uniform(kb, (fan_out,), jnp.float32, -bound, bound)
        return w, b

    w1, b1 = lin(ks[0], ks[1], input_size, hidden_size)
    w2, b2 = lin(ks[2], ks[3], hidden_size, output_size)
    wg, bg = lin(ks[4], ks[5], output_size, g_size)
    return {"w1": w1, "b1": b1, "w2": w2, "b2": b2, "wg": wg, "bg": bg}


def _reference(x, p, ref=False):
    h = jnp.maximum(x @ p["w1"] + p["b1"], 0.0)
    h = jnp.maximum(h @ p["w2"] + p["b2"], 0.0)
    if not ref:
        h = jnp.maximum(h @ p["wg"] + p["bg"], 0.0)
    return h


if __name__ == "__main__":
    key = jax.random.PRNGKey(0)
    k_x, k_p, k_x2 = jax.random.split(key, 3)

    B, input_size, hidden_size, output_size, g_size = 8, 32, 64, 16, 64
    x = jax.random.normal(k_x, (B, input_size), jnp.float32)
    params = init_params(k_p, input_size, hidden_size, output_size, g_size)

    # One-time parameter preparation (padding + dtype casting), reused per call.
    prepared_bf16 = prepare_params(params, use_bf16=True)
    prepared_f32 = prepare_params(params, use_bf16=False)

    # bf16 compute path (default), loose tolerance vs f32 reference
    out = jax.block_until_ready(linear_probe_glayer(x, prepared_bf16, ref=False))
    expected = _reference(x, params, ref=False)
    assert out.shape == (B, g_size), out.shape
    assert jnp.allclose(out, expected, atol=5e-2, rtol=5e-2), "bf16 path mismatch"

    # pure-f32 path, tight tolerance (validates padding/tiling exactness)
    out_f32 = jax.block_until_ready(linear_probe_glayer(x, prepared_f32, ref=False))
    assert jnp.allclose(out_f32, expected, atol=1e-5, rtol=1e-5), "f32 path mismatch"

    # ref=True branch (skips linear_g)
    out_ref = jax.block_until_ready(linear_probe_glayer(x, prepared_f32, ref=True))
    expected_ref = _reference(x, params, ref=True)
    assert out_ref.shape == (B, output_size)
    assert jnp.allclose(out_ref, expected_ref, atol=1e-5, rtol=1e-5), "ref path mismatch"

    # multi-step grid with a batch that does not divide the block size
    B2 = 300
    x2 = jax.random.normal(k_x2, (B2, input_size), jnp.float32)
    out2 = jax.block_until_ready(
        linear_probe_glayer(x2, prepared_f32, ref=False, block_b=128))
    expected2 = _reference(x2, params, ref=False)
    assert out2.shape == (B2, g_size)
    assert jnp.allclose(out2, expected2, atol=1e-5, rtol=1e-5), "tiled path mismatch"

    print("KERNEL_OK")
</pallas_src>

<mosaic_0001>
module attributes {stable_mosaic.version = 11 : i64} {
  func.func @_mlp_g_kernel(%arg0: i32, %arg1: memref<8x128xf32, #tpu.memory_space<vmem>>, %arg2: memref<128x128xbf16, #tpu.memory_space<vmem>>, %arg3: memref<1x128xf32, #tpu.memory_space<vmem>>, %arg4: memref<128x128xbf16, #tpu.memory_space<vmem>>, %arg5: memref<1x128xf32, #tpu.memory_space<vmem>>, %arg6: memref<128x128xbf16, #tpu.memory_space<vmem>>, %arg7: memref<1x128xf32, #tpu.memory_space<vmem>>, %arg8: memref<8x128xf32, #tpu.memory_space<vmem>>) attributes {dimension_semantics = [#tpu.dimension_semantics<parallel>], iteration_bounds = array<i64: 1>, scalar_prefetch = 0 : i64, scratch_operands = 0 : i64, tpu.core_type = #tpu.core_type<tc>, window_params = [{transform_indices = @transform_0, window_bounds = array<i64: 8, 128>}, {pipeline_mode = #tpu.pipeline_mode<synchronous>, transform_indices = @transform_1, window_bounds = array<i64: 128, 128>}, {pipeline_mode = #tpu.pipeline_mode<synchronous>, transform_indices = @transform_2, window_bounds = array<i64: 1, 128>}, {pipeline_mode = #tpu.pipeline_mode<synchronous>, transform_indices = @transform_3, window_bounds = array<i64: 128, 128>}, {pipeline_mode = #tpu.pipeline_mode<synchronous>, transform_indices = @transform_4, window_bounds = array<i64: 1, 128>}, {pipeline_mode = #tpu.pipeline_mode<synchronous>, transform_indices = @transform_5, window_bounds = array<i64: 128, 128>}, {pipeline_mode = #tpu.pipeline_mode<synchronous>, transform_indices = @transform_6, window_bounds = array<i64: 1, 128>}, {transform_indices = @transform_7, window_bounds = array<i64: 8, 128>}]} {
    %c0 = arith.constant 0 : index
    %c0_0 = arith.constant 0 : index
    %0 = vector.load %arg1[%c0, %c0_0] : memref<8x128xf32, #tpu.memory_space<vmem>>, vector<8x128xf32>
    %1 = arith.truncf %0 : vector<8x128xf32> to vector<8x128xbf16>
    %c0_1 = arith.constant 0 : index
    %c0_2 = arith.constant 0 : index
    %2 = vector.load %arg2[%c0_1, %c0_2] : memref<128x128xbf16, #tpu.memory_space<vmem>>, vector<128x128xbf16>
    %cst = arith.constant dense<0.000000e+00> : vector<8x128xf32>
    %3 = tpu.matmul %1, %2, %cst {dimension_numbers = #tpu.dot_dimension_numbers<[1], [0], [0], [1], [0, 0, 1, 1], [], []>} : vector<8x128xbf16>, vector<128x128xbf16>, vector<8x128xf32> -> vector<8x128xf32>
    %c0_3 = arith.constant 0 : index
    %c0_4 = arith.constant 0 : index
    %4 = vector.load %arg3[%c0_3, %c0_4] : memref<1x128xf32, #tpu.memory_space<vmem>>, vector<1x128xf32>
    %5 = vector.broadcast %4 : vector<1x128xf32> to vector<8x128xf32>
    %6 = arith.addf %3, %5 : vector<8x128xf32>
    %cst_5 = arith.constant 0.000000e+00 : f32
    %7 = vector.broadcast %cst_5 : f32 to vector<8x128xf32>
    %8 = arith.maximumf %6, %7 : vector<8x128xf32>
    %9 = arith.truncf %8 : vector<8x128xf32> to vector<8x128xbf16>
    %c0_6 = arith.constant 0 : index
    %c0_7 = arith.constant 0 : index
    %10 = vector.load %arg4[%c0_6, %c0_7] : memref<128x128xbf16, #tpu.memory_space<vmem>>, vector<128x128xbf16>
    %cst_8 = arith.constant dense<0.000000e+00> : vector<8x128xf32>
    %11 = tpu.matmul %9, %10, %cst_8 {dimension_numbers = #tpu.dot_dimension_numbers<[1], [0], [0], [1], [0, 0, 1, 1], [], []>} : vector<8x128xbf16>, vector<128x128xbf16>, vector<8x128xf32> -> vector<8x128xf32>
    %c0_9 = arith.constant 0 : index
    %c0_10 = arith.constant 0 : index
    %12 = vector.load %arg5[%c0_9, %c0_10] : memref<1x128xf32, #tpu.memory_space<vmem>>, vector<1x128xf32>
    %13 = vector.broadcast %12 : vector<1x128xf32> to vector<8x128xf32>
    %14 = arith.addf %11, %13 : vector<8x128xf32>
    %cst_11 = arith.constant 0.000000e+00 : f32
    %15 = vector.broadcast %cst_11 : f32 to vector<8x128xf32>
    %16 = arith.maximumf %14, %15 : vector<8x128xf32>
    %17 = arith.truncf %16 : vector<8x128xf32> to vector<8x128xbf16>
    %c0_12 = arith.constant 0 : index
    %c0_13 = arith.constant 0 : index
    %18 = vector.load %arg6[%c0_12, %c0_13] : memref<128x128xbf16, #tpu.memory_space<vmem>>, vector<128x128xbf16>
    %cst_14 = arith.constant dense<0.000000e+00> : vector<8x128xf32>
    %19 = tpu.matmul %17, %18, %cst_14 {dimension_numbers = #tpu.dot_dimension_numbers<[1], [0], [0], [1], [0, 0, 1, 1], [], []>} : vector<8x128xbf16>, vector<128x128xbf16>, vector<8x128xf32> -> vector<8x128xf32>
    %c0_15 = arith.constant 0 : index
    %c0_16 = arith.constant 0 : index
    %20 = vector.load %arg7[%c0_15, %c0_16] : memref<1x128xf32, #tpu.memory_space<vmem>>, vector<1x128xf32>
    %21 = vector.broadcast %20 : vector<1x128xf32> to vector<8x128xf32>
    %22 = arith.addf %19, %21 : vector<8x128xf32>
    %cst_17 = arith.constant 0.000000e+00 : f32
    %23 = vector.broadcast %cst_17 : f32 to vector<8x128xf32>
    %24 = arith.maximumf %22, %23 : vector<8x128xf32>
    %c0_18 = arith.constant 0 : index
    %c0_19 = arith.constant 0 : index
    %25 = vector.load %arg8[%c0_18, %c0_19] : memref<8x128xf32, #tpu.memory_space<vmem>>, vector<8x128xf32>
    tpu.vector_store %arg8[%c0_18, %c0_19], %24 {strides = array<i32>} : memref<8x128xf32, #tpu.memory_space<vmem>>, vector<8x128xf32>,
    return
  }
  func.func @transform_0(%arg0: i32) -> (i32, i32) {
    %c0_i32 = arith.constant 0 : i32
    %c0_i32_0 = arith.constant 0 : i32
    return %arg0, %c0_i32 : i32, i32
  }
  func.func @transform_1(%arg0: i32) -> (i32, i32) {
    %c0_i32 = arith.constant 0 : i32
    %c0_i32_0 = arith.constant 0 : i32
    %c0_i32_1 = arith.constant 0 : i32
    return %c0_i32, %c0_i32_0 : i32, i32
  }
  func.func @transform_2(%arg0: i32) -> (i32, i32) {
    %c0_i32 = arith.constant 0 : i32
    %c0_i32_0 = arith.constant 0 : i32
    %c0_i32_1 = arith.constant 0 : i32
    return %c0_i32, %c0_i32_0 : i32, i32
  }
  func.func @transform_3(%arg0: i32) -> (i32, i32) {
    %c0_i32 = arith.constant 0 : i32
    %c0_i32_0 = arith.constant 0 : i32
    %c0_i32_1 = arith.constant 0 : i32
    return %c0_i32, %c0_i32_0 : i32, i32
  }
  func.func @transform_4(%arg0: i32) -> (i32, i32) {
    %c0_i32 = arith.constant 0 : i32
    %c0_i32_0 = arith.constant 0 : i32
    %c0_i32_1 = arith.constant 0 : i32
    return %c0_i32, %c0_i32_0 : i32, i32
  }
  func.func @transform_5(%arg0: i32) -> (i32, i32) {
    %c0_i32 = arith.constant 0 : i32
    %c0_i32_0 = arith.constant 0 : i32
    %c0_i32_1 = arith.constant 0 : i32
    return %c0_i32, %c0_i32_0 : i32, i32
  }
  func.func @transform_6(%arg0: i32) -> (i32, i32) {
    %c0_i32 = arith.constant 0 : i32
    %c0_i32_0 = arith.constant 0 : i32
    %c0_i32_1 = arith.constant 0 : i32
    return %c0_i32, %c0_i32_0 : i32, i32
  }
  func.func @transform_7(%arg0: i32) -> (i32, i32) {
    %c0_i32 = arith.constant 0 : i32
    %c0_i32_0 = arith.constant 0 : i32
    return %arg0, %c0_i32 : i32, i32
  }
}

</mosaic_0001>

<bundles_post_ra>
// kernel: _forward.1
= control target key start
LH: loop header
LB: loop body
LE: loop exit
PB: predicated region body
PF: predicated region fallthrough
CT: control target
= control target key end

     0   :  { %12 = vsyncpa [#allocation3], 0  ;;  %s644_s0 = inlined_call_operand.vmem [shape: f32[8,128], index: 0, kind: input, shape index: {}]   ;;  %s645_s1 = inlined_call_operand.hbm [shape: bf16[128,128], index: 1, kind: input, shape index: {}]   ;;  %s646_s2 = inlined_call_operand.vmem [shape: f32[1,128], index: 2, kind: input, shape index: {}]   ;;  %s647_s3 = inlined_call_operand.hbm [shape: bf16[128,128], index: 3, kind: input, shape index: {}]   ;;  %s648_s4 = inlined_call_operand.vmem [shape: f32[1,128], index: 4, kind: input, shape index: {}]   ;;  %s649_s5 = inlined_call_operand.hbm [shape: bf16[128,128], index: 5, kind: input, shape index: {}]   ;;  %s650_s6 = inlined_call_operand.vmem [shape: f32[1,128], index: 6, kind: input, shape index: {}]   ;;  %s651_s7 = inlined_call_operand.hbm [shape: f32[8,128], index: 7, kind: output, shape index: {}]  }
   0x1   :  { %13 = vsyncpa [#allocation6], 0 }
   0x2   :  { %14 = vsyncpa [#allocation4], 0  ;;  %s36_s26 = sshll.u32 %s647_s3, 4  ;;  %s574_s27 = smov [#allocation5]   ;;  %s37_s26 = int_to_ptr.hbm [resolvable:$true] %s36_s26 }
   0x3   :  { %s38_s28 = sshll.u32 %s574_s27, 4  ;;  %s21_s8 = sshll.u32 %s645_s1, 4  ;;  %s39_s28 = int_to_ptr.vmem [resolvable:$true] %s38_s28  ;;  %s22_s8 = int_to_ptr.hbm [resolvable:$true] %s21_s8 }
   0x4   :  { %s575_s9 = smov 64   ;;  %s576_s10 = smov 4  }
   0x5   :  { %44 = dma.hbm_to_vmem [thread:$0]  %s37_s26, 1024, %s39_s28, [#allocation6], %s575_s9, %s575_s9, %s576_s10  }
   0x6   :  { %s577_s11 = smov [#allocation2]   ;;  %s51_s15 = sshll.u32 %s649_s5, 4  ;;  %s52_s15 = int_to_ptr.hbm [resolvable:$true] %s51_s15 }
   0x7   :  { %s23_s12 = sshll.u32 %s577_s11, 4  ;;  %s578_s3 = smov [#allocation7]   ;;  %s24_s12 = int_to_ptr.vmem [resolvable:$true] %s23_s12 }
   0x8   :  { %29 = dma.hbm_to_vmem [thread:$0]  %s22_s8, 1024, %s24_s12, [#allocation3], %s575_s9, %s575_s9, %s576_s10  }
   0x9   :  { %s53_s16 = sshll.u32 %s578_s3, 4  ;;  %s54_s16 = int_to_ptr.vmem [resolvable:$true] %s53_s16 }
   0xa   :  { %59 = dma.hbm_to_vmem [thread:$0]  %s52_s15, 1024, %s54_s16, [#allocation6], %s575_s9, %s575_s9, %s576_s10  }
   0xb   :  { %568 = dma.done.wait [#allocation3], 1024  }
   0xc   :  { %569 = vsyncadd [#allocation3], 4294966272 }
   0xd   :  { %570 = dma.done.wait [#allocation6], 2048  }
   0xe   :  { %571 = vsyncadd [#allocation6], 4294965248  ;;  %v446_v0 = vld [vmem:[#allocation2 + $0x38] sm:$0xff]  ;;  %v445_v1 = vld [vmem:[#allocation2 + $0x30] sm:$0xff]  ;;  %s579_s21 = smov [#allocation8]   ;;  %s332_s25 = sshll.u32 %s651_s7, 4  ;;  %s333_s25 = int_to_ptr.hbm [resolvable:$true] %s332_s25 }
   0xf   :  { %144 = vmatpush.bf16.msra.mxu0 %v446_v0  ;;  %v454_v2 = vld [vmem:[#allocation5 + $0x38] sm:$0xff]  ;;  %v453_v3 = vld [vmem:[#allocation5 + $0x30] sm:$0xff]  ;;  %v444_v4 = vld [vmem:[#allocation2 + $0x28] sm:$0xff]  ;;  %s330_s22 = sshll.u32 %s579_s21, 4  ;;  %s331_s22 = int_to_ptr.vmem [resolvable:$true] %s330_s22 }
  0x10   :  { %227 = vmatpush.bf16.msra.mxu1 %v454_v2  ;;  %v452_v5 = vld [vmem:[#allocation5 + $0x28] sm:$0xff]  ;;  %v443_v6 = vld [vmem:[#allocation2 + $0x20] sm:$0xff]  ;;  %v442_v8 = vld [vmem:[#allocation2 + $0x18] sm:$0xff] }
  0x11   :  { %v451_v7 = vld [vmem:[#allocation5 + $0x20] sm:$0xff]  ;;  %v450_v9 = vld [vmem:[#allocation5 + $0x18] sm:$0xff]  ;;  %v441_v10 = vld [vmem:[#allocation2 + $0x10] sm:$0xff] }
  0x12   :  { %v449_v11 = vld [vmem:[#allocation5 + $0x10] sm:$0xff]  ;;  %v440_v12 = vld [vmem:[#allocation2 + $0x8] sm:$0xff]  ;;  %v439_v13 = vld [vmem:[#allocation2] sm:$0xff] }
  0x13   :  { %145 = vmatpush.bf16.msra.mxu0 %v445_v1  ;;  %v74_v14 = vld [vmem:[%s644_s0] sm:$0xff]  ;;  %v448_v16 = vld [vmem:[#allocation5 + $0x8] sm:$0xff]  ;;  %v462_v18 = vld [vmem:[#allocation7 + $0x38] sm:$0xff] }
  0x14   :  { %228 = vmatpush.bf16.msra.mxu1 %v453_v3  ;;  %v75_v15 = vpack.c.bf16 %v74_v14, %v74_v14  ;;  %v447_v17 = vld [vmem:[#allocation5] sm:$0xff]  ;;  %310 = vmatpush.bf16.msra.mxu2 %v462_v18  ;;  %v461_v19 = vld [vmem:[#allocation7 + $0x30] sm:$0xff]  ;;  %v460_v20 = vld [vmem:[#allocation7 + $0x28] sm:$0xff] }
  0x15   :  { %v459_v21 = vld [vmem:[#allocation7 + $0x20] sm:$0xff]  ;;  %v458_v22 = vld [vmem:[#allocation7 + $0x18] sm:$0xff]  ;;  %v457_v23 = vld [vmem:[#allocation7 + $0x10] sm:$0xff] }
  0x16   :  { %v469_v24 = vld [vmem:[%s646_s2] ss:$0 sm:$0xff]  ;;  %v456_v30 = vld [vmem:[#allocation7 + $0x8] sm:$0xff] }
  0x17   :  { %146 = vmatpush.bf16.msra.mxu0 %v444_v4  ;;  %v455_v31 = vld [vmem:[#allocation7] sm:$0xff] }
  0x18   :  { %229 = vmatpush.bf16.msra.mxu1 %v452_v5  ;;  %311 = vmatpush.bf16.msra.mxu2 %v461_v19  ;;  %v470_v32 = vld [vmem:[%s648_s4] ss:$0 sm:$0xff] }
  0x19   :  { %v471_v38 = vld [vmem:[%s650_s6] ss:$0 sm:$0xff] }
  0x1b   :  { %147 = vmatpush.bf16.msra.mxu0 %v443_v6 }
  0x1c   :  { %230 = vmatpush.bf16.msra.mxu1 %v451_v7  ;;  %312 = vmatpush.bf16.msra.mxu2 %v460_v20 }
  0x1f   :  { %148 = vmatpush.bf16.msra.mxu0 %v442_v8 }
  0x20   :  { %231 = vmatpush.bf16.msra.mxu1 %v450_v9  ;;  %313 = vmatpush.bf16.msra.mxu2 %v459_v21 }
  0x23   :  { %149 = vmatpush.bf16.msra.mxu0 %v441_v10 }
  0x24   :  { %232 = vmatpush.bf16.msra.mxu1 %v449_v11  ;;  %314 = vmatpush.bf16.msra.mxu2 %v458_v22 }
  0x27   :  { %150 = vmatpush.bf16.msra.mxu0 %v440_v12 }
  0x28   :  { %233 = vmatpush.bf16.msra.mxu1 %v448_v16  ;;  %315 = vmatpush.bf16.msra.mxu2 %v457_v23 }
  0x2b   :  { %151 = vmatpush.bf16.msra.mxu0 %v439_v13 }
  0x2c   :  { %234 = vmatpush.bf16.msra.mxu1 %v447_v17  ;;  %316 = vmatpush.bf16.msra.mxu2 %v456_v30 }
  0x2e   :  { %152 = vmatmul.bf16.vlgmr.msra.gmra.mxu0 %v75_v15 }
  0x30   :  { %317 = vmatpush.bf16.msra.mxu2 %v455_v31 }
  0xab   :  { %v153_v25 = vpop.f32.mrf.mxu0 }
  0xac   :  { %v154_v26 = vadd.f32 %v469_v24, %v153_v25 }
  0xae   :  { %v157_v27 = vmax.f32 %v154_v26, 0.0 }
  0xb0   :  { %v158_v28 = vpack.c.bf16 %v157_v27, %v157_v27 }
  0xb2   :  { %235 = vmatmul.bf16.vlgmr.msra.gmra.mxu1 %v158_v28 }
  0xb3   :  { %v155_v29 = vpop.f32.mrf.mxu0 }
 0x12f   :  { %v236_v33 = vpop.f32.mrf.mxu1 }
 0x130   :  { %v237_v34 = vadd.f32 %v470_v32, %v236_v33 }
 0x132   :  { %v240_v35 = vmax.f32 %v237_v34, 0.0 }
 0x134   :  { %v241_v36 = vpack.c.bf16 %v240_v35, %v240_v35 }
 0x136   :  { %318 = vmatmul.bf16.vlgmr.msra.gmra.mxu2 %v241_v36 }
 0x137   :  { %v238_v37 = vpop.f32.mrf.mxu1 }
 0x1b9   :  { %v319_v39 = vpop.f32.mrf.mxu2 }
 0x1ba   :  { %v320_v40 = vadd.f32 %v471_v38, %v319_v39 }
 0x1bc   :  { %v323_v41 = vmax.f32 %v320_v40, 0.0 }
 0x1be   :  { %324 = vst [vmem:[#allocation8] sm:$0xff] %v323_v41 }
 0x1bf   :  { %335 = dma.vmem_to_hbm [thread:$0]  %s331_s22, 128, %s333_s25, [#allocation4]  }
 0x1c1   :  { %v321_v42 = vpop.f32.mrf.mxu2 }
 0x1c2   :  { %572 = dma.done.wait [#allocation4], 128  }
 0x1c3   :  { %573 = vsyncadd [#allocation4], 4294967168 }
 0x1c4   :  { %340 = vsyncpa [#allocation3], 1 }
 0x1c5   :  { %341 = vsyncpa [#allocation6], 1 }
 0x1c6   :  { %342 = vsyncpa [#allocation4], 1 }

</bundles_post_ra>
